<compile_context>
chip_gen: v7x
topology: tpu7x:2x2x1
jax: 0.10.0
libtpu: 0.0.40
codegen_flags: <defaults>
</compile_context>

<pallas_src>
import jax
import jax.numpy as jnp
from jax import lax
from jax.experimental import pallas as pl
from jax.experimental.pallas import tpu as pltpu

EPS = 1e-5          # InstanceNorm2d default eps
NEG_SLOPE = 0.2     # LeakyReLU slope
KSIZE = 4
STRIDE = 2
PAD = 1


def _unet_up_kernel(x_ref, w_ref, o_ref):
    # x_ref: (1, 9*Cin, S)      3x3-tap columns for one sample (bf16), S = H*W
    # w_ref: (1, R, 9*Cin)      phase-decomposed weights for one channel tile, R = 4*ct
    # o_ref: (1, 1, R, S)       normalized + activated phase outputs (row = phase*ct + ch)
    R = w_ref.shape[1]
    ct = R // 4
    S = x_ref.shape[2]

    # All four output-parity phases of the transposed conv in one MXU matmul (f32 accum).
    z = jnp.dot(w_ref[0], x_ref[0], preferred_element_type=jnp.float32)    # (R, S)

    # InstanceNorm2d stats: fused sum / sum-of-squares over the full 2H x 2W extent
    # (= the 4 phase slabs together).  Slab add is VALU; one lane reduce per channel.
    zsq = z * z
    zc = z[0:ct] + z[ct:2 * ct] + z[2 * ct:3 * ct] + z[3 * ct:4 * ct]       # (ct, S)
    zc2 = zsq[0:ct] + zsq[ct:2 * ct] + zsq[2 * ct:3 * ct] + zsq[3 * ct:4 * ct]
    inv_count = 1.0 / (4.0 * S)
    mean = jnp.sum(zc, axis=-1, keepdims=True) * inv_count                 # (ct, 1)
    ex2 = jnp.sum(zc2, axis=-1, keepdims=True) * inv_count
    inv_std = lax.rsqrt(ex2 - mean * mean + EPS)                           # (ct, 1)

    shift = jnp.concatenate([mean, mean, mean, mean], axis=0)              # (R, 1)
    scale = jnp.concatenate([inv_std, inv_std, inv_std, inv_std], axis=0)  # (R, 1)

    yn = (z - shift) * scale
    act = jnp.maximum(yn, NEG_SLOPE * yn)        # LeakyReLU(0.2); Dropout(p=0) is identity
    o_ref[0, 0] = act.astype(o_ref.dtype)        # single full-tile, lane-dense store


def _build_phase_weight(weight, ct):
    """weight: (Cin, Cout, 4, 4) PyTorch ConvTranspose2d layout ->
    (n_ct, 4*ct, 9*Cin): per channel-tile, phase-major (p = py*2+px) rows over a
    3x3-tap / Cin column ordering (k = (ty*3+tx)*Cin + ci)."""
    cin, cout = weight.shape[0], weight.shape[1]
    n_ct = cout // ct
    rows = []
    for py in range(2):
        for px in range(2):
            blocks = []
            for ty in range(3):
                for tx in range(3):
                    dy, dx = ty - py, tx - px
                    if 0 <= dy <= 1 and 0 <= dx <= 1:
                        kh = (3 - 2 * dy) if py == 0 else (2 - 2 * dy)
                        kw = (3 - 2 * dx) if px == 0 else (2 - 2 * dx)
                        blk = weight[:, :, kh, kw].T          # (Cout, Cin)
                    else:
                        blk = jnp.zeros((cout, cin), weight.dtype)
                    blocks.append(blk)
            rows.append(jnp.concatenate(blocks, axis=1))      # (Cout, 9*Cin)
    w_big = jnp.stack(rows, axis=0)                           # (4, Cout, 9*Cin)
    return (w_big.reshape(4, n_ct, ct, 9 * cin)
                 .transpose(1, 0, 2, 3)
                 .reshape(n_ct, 4 * ct, 9 * cin))


def unet_up_forward(x, weight, skip, *, matmul_dtype=jnp.bfloat16):
    """x: (N, Cin, H, W); weight: (Cin, Cout, 4, 4); skip: (N, Cskip, 2H, 2W).
    Returns (N, Cout+Cskip, 2H, 2W)."""
    N, Cin, H, W = x.shape
    Cout = weight.shape[1]
    H2, W2 = STRIDE * H, STRIDE * W
    S = H * W
    K = 9 * Cin

    # Channel tile: 4*ct rows per matmul (keeps stores sublane-aligned, fills MXU M dim,
    # and gives the grid a second parallel axis for larger Cout).
    ct = next(c for c in (64, 32, 16, 8, 4, 2, 1) if Cout % c == 0)
    n_ct = Cout // ct
    R = 4 * ct
    out_dtype = x.dtype

    # ---- glue: pad once, 3x3 im2col of the ORIGINAL-resolution input (no zero dilation) ----
    xp = jnp.pad(x, ((0, 0), (0, 0), (1, 1), (1, 1)))
    taps = [xp[:, :, ty:ty + H, tx:tx + W] for ty in range(3) for tx in range(3)]
    cols = jnp.stack(taps, axis=1).reshape(N, K, S).astype(matmul_dtype)

    w_tiled = _build_phase_weight(weight, ct).astype(matmul_dtype)         # (n_ct, R, K)

    z = pl.pallas_call(
        _unet_up_kernel,
        out_shape=jax.ShapeDtypeStruct((N, n_ct, R, S), out_dtype),
        grid=(N, n_ct),
        in_specs=[
            pl.BlockSpec((1, K, S), lambda n, j: (n, 0, 0)),      # columns: per sample
            pl.BlockSpec((1, R, K), lambda n, j: (j, 0, 0)),      # weights: per channel tile
        ],
        out_specs=pl.BlockSpec((1, 1, R, S), lambda n, j: (n, j, 0, 0)),
        compiler_params=pltpu.CompilerParams(
            dimension_semantics=("parallel", "parallel")),
    )(cols, w_tiled)

    # ---- glue: pixel-shuffle the 4 phases back to (N, Cout, 2H, 2W), concat skip in XLA ----
    act = (z.reshape(N, n_ct, 2, 2, ct, H, W)
             .transpose(0, 1, 4, 5, 2, 6, 3)
             .reshape(N, Cout, H2, W2))
    return jnp.concatenate([act, skip.astype(out_dtype)], axis=1)


def unet_up_reference(x, weight, skip):
    """Pure-JAX (f32) reference matching PyTorch semantics."""
    kern = jnp.transpose(weight, (1, 0, 2, 3))[:, :, ::-1, ::-1]  # (Cout, Cin, 4, 4)
    y = lax.conv_general_dilated(
        x, kern, window_strides=(1, 1), padding=((2, 2), (2, 2)),
        lhs_dilation=(STRIDE, STRIDE), rhs_dilation=(1, 1),
        dimension_numbers=("NCHW", "OIHW", "NCHW"))
    mean = jnp.mean(y, axis=(2, 3), keepdims=True)
    var = jnp.mean((y - mean) ** 2, axis=(2, 3), keepdims=True)
    yn = (y - mean) / jnp.sqrt(var + EPS)
    act = jnp.maximum(yn, NEG_SLOPE * yn)
    return jnp.concatenate([act, skip], axis=1)


if __name__ == "__main__":
    # Small shapes consistent with the module: in_size=8, out_size=4, 16x16 -> 32x32.
    N, Cin, Cout, H, W = 2, 8, 4, 16, 16
    Cskip = Cout

    key = jax.random.PRNGKey(0)
    kx, kw, ks = jax.random.split(key, 3)
    x = jax.random.normal(kx, (N, Cin, H, W), jnp.float32)
    weight = 0.1 * jax.random.normal(kw, (Cin, Cout, KSIZE, KSIZE), jnp.float32)
    skip = jax.random.normal(ks, (N, Cskip, 2 * H, 2 * W), jnp.float32)

    out = unet_up_forward(x, weight, skip)
    out = jax.block_until_ready(out)

    ref = unet_up_reference(x, weight, skip)
    assert out.shape == (N, Cout + Cskip, 2 * H, 2 * W), out.shape
    max_err = float(jnp.max(jnp.abs(out - ref)))
    # bf16 matmul operands vs f32 reference -> loosened tolerance.
    assert jnp.allclose(out, ref, atol=3e-2, rtol=3e-2), max_err

    print("KERNEL_OK")
</pallas_src>

<mosaic_0001>
module attributes {stable_mosaic.version = 11 : i64} {
  func.func @_unet_up_kernel(%arg0: i32, %arg1: i32, %arg2: memref<1x72x256xbf16, #tpu.memory_space<vmem>>, %arg3: memref<1x16x72xbf16, #tpu.memory_space<vmem>>, %arg4: memref<1x1x16x256xf32, #tpu.memory_space<vmem>>) attributes {dimension_semantics = [#tpu.dimension_semantics<parallel>, #tpu.dimension_semantics<parallel>], iteration_bounds = array<i64: 2, 1>, scalar_prefetch = 0 : i64, scratch_operands = 0 : i64, tpu.core_type = #tpu.core_type<tc>, window_params = [{transform_indices = @transform_0, window_bounds = array<i64: 1, 72, 256>}, {transform_indices = @transform_1, window_bounds = array<i64: 1, 16, 72>}, {transform_indices = @transform_2, window_bounds = array<i64: 1, 1, 16, 256>}]} {
    %c0 = arith.constant 0 : index
    %c0_0 = arith.constant 0 : index
    %c0_1 = arith.constant 0 : index
    %0 = vector.load %arg3[%c0, %c0_0, %c0_1] : memref<1x16x72xbf16, #tpu.memory_space<vmem>>, vector<1x16x72xbf16>
    %1 = vector.shape_cast %0 : vector<1x16x72xbf16> to vector<16x72xbf16>
    %c0_2 = arith.constant 0 : index
    %c0_3 = arith.constant 0 : index
    %c0_4 = arith.constant 0 : index
    %2 = vector.load %arg2[%c0_2, %c0_3, %c0_4] : memref<1x72x256xbf16, #tpu.memory_space<vmem>>, vector<1x72x256xbf16>
    %3 = vector.shape_cast %2 : vector<1x72x256xbf16> to vector<72x256xbf16>
    %cst = arith.constant dense<0.000000e+00> : vector<16x256xf32>
    %4 = tpu.matmul %1, %3, %cst {dimension_numbers = #tpu.dot_dimension_numbers<[1], [0], [0], [1], [0, 0, 1, 1], [], []>} : vector<16x72xbf16>, vector<72x256xbf16>, vector<16x256xf32> -> vector<16x256xf32>
    %5 = arith.mulf %4, %4 : vector<16x256xf32>
    %6 = vector.extract_strided_slice %4 {offsets = [0, 0], sizes = [4, 256], strides = [1, 1]} : vector<16x256xf32> to vector<4x256xf32>
    %7 = vector.extract_strided_slice %4 {offsets = [4, 0], sizes = [4, 256], strides = [1, 1]} : vector<16x256xf32> to vector<4x256xf32>
    %8 = arith.addf %6, %7 : vector<4x256xf32>
    %9 = vector.extract_strided_slice %4 {offsets = [8, 0], sizes = [4, 256], strides = [1, 1]} : vector<16x256xf32> to vector<4x256xf32>
    %10 = arith.addf %8, %9 : vector<4x256xf32>
    %11 = vector.extract_strided_slice %4 {offsets = [12, 0], sizes = [4, 256], strides = [1, 1]} : vector<16x256xf32> to vector<4x256xf32>
    %12 = arith.addf %10, %11 : vector<4x256xf32>
    %13 = vector.extract_strided_slice %5 {offsets = [0, 0], sizes = [4, 256], strides = [1, 1]} : vector<16x256xf32> to vector<4x256xf32>
    %14 = vector.extract_strided_slice %5 {offsets = [4, 0], sizes = [4, 256], strides = [1, 1]} : vector<16x256xf32> to vector<4x256xf32>
    %15 = arith.addf %13, %14 : vector<4x256xf32>
    %16 = vector.extract_strided_slice %5 {offsets = [8, 0], sizes = [4, 256], strides = [1, 1]} : vector<16x256xf32> to vector<4x256xf32>
    %17 = arith.addf %15, %16 : vector<4x256xf32>
    %18 = vector.extract_strided_slice %5 {offsets = [12, 0], sizes = [4, 256], strides = [1, 1]} : vector<16x256xf32> to vector<4x256xf32>
    %19 = arith.addf %17, %18 : vector<4x256xf32>
    %cst_5 = arith.constant dense<0.000000e+00> : vector<4xf32>
    %20 = vector.multi_reduction <add>, %12, %cst_5 [1] : vector<4x256xf32> to vector<4xf32>
    %21 = vector.shape_cast %20 : vector<4xf32> to vector<4x1xf32>
    %cst_6 = arith.constant 9.765625E-4 : f32
    %22 = vector.broadcast %cst_6 : f32 to vector<4x1xf32>
    %23 = arith.mulf %21, %22 : vector<4x1xf32>
    %cst_7 = arith.constant dense<0.000000e+00> : vector<4xf32>
    %24 = vector.multi_reduction <add>, %19, %cst_7 [1] : vector<4x256xf32> to vector<4xf32>
    %25 = vector.shape_cast %24 : vector<4xf32> to vector<4x1xf32>
    %cst_8 = arith.constant 9.765625E-4 : f32
    %26 = vector.broadcast %cst_8 : f32 to vector<4x1xf32>
    %27 = arith.mulf %25, %26 : vector<4x1xf32>
    %28 = arith.mulf %23, %23 : vector<4x1xf32>
    %29 = arith.subf %27, %28 : vector<4x1xf32>
    %cst_9 = arith.constant 9.99999974E-6 : f32
    %30 = vector.broadcast %cst_9 : f32 to vector<4x1xf32>
    %31 = arith.addf %29, %30 : vector<4x1xf32>
    %32 = math.rsqrt %31 : vector<4x1xf32>
    %33 = tpu.concatenate %23, %23, %23, %23 in 0 : vector<4x1xf32>, vector<4x1xf32>, vector<4x1xf32>, vector<4x1xf32> -> vector<16x1xf32>
    %34 = tpu.concatenate %32, %32, %32, %32 in 0 : vector<4x1xf32>, vector<4x1xf32>, vector<4x1xf32>, vector<4x1xf32> -> vector<16x1xf32>
    %35 = vector.broadcast %33 : vector<16x1xf32> to vector<16x256xf32>
    %36 = arith.subf %4, %35 : vector<16x256xf32>
    %37 = vector.broadcast %34 : vector<16x1xf32> to vector<16x256xf32>
    %38 = arith.mulf %36, %37 : vector<16x256xf32>
    %cst_10 = arith.constant 2.000000e-01 : f32
    %39 = vector.broadcast %cst_10 : f32 to vector<16x256xf32>
    %40 = arith.mulf %39, %38 : vector<16x256xf32>
    %41 = arith.maximumf %38, %40 : vector<16x256xf32>
    %c0_11 = arith.constant 0 : index
    %c0_12 = arith.constant 0 : index
    %c0_13 = arith.constant 0 : index
    %c0_14 = arith.constant 0 : index
    %42 = vector.load %arg4[%c0_11, %c0_12, %c0_13, %c0_14] : memref<1x1x16x256xf32, #tpu.memory_space<vmem>>, vector<1x1x16x256xf32>
    %43 = vector.shape_cast %42 : vector<1x1x16x256xf32> to vector<16x256xf32>
    %44 = vector.shape_cast %41 : vector<16x256xf32> to vector<1x1x16x256xf32>
    tpu.vector_store %arg4[%c0_11, %c0_12, %c0_13, %c0_14], %44 {strides = array<i32>} : memref<1x1x16x256xf32, #tpu.memory_space<vmem>>, vector<1x1x16x256xf32>,
    return
  }
  func.func @transform_0(%arg0: i32, %arg1: i32) -> (i32, i32, i32) {
    %c0_i32 = arith.constant 0 : i32
    %c0_i32_0 = arith.constant 0 : i32
    %c0_i32_1 = arith.constant 0 : i32
    return %arg0, %c0_i32, %c0_i32_0 : i32, i32, i32
  }
  func.func @transform_1(%arg0: i32, %arg1: i32) -> (i32, i32, i32) {
    %c0_i32 = arith.constant 0 : i32
    %c0_i32_0 = arith.constant 0 : i32
    %c0_i32_1 = arith.constant 0 : i32
    return %arg1, %c0_i32, %c0_i32_0 : i32, i32, i32
  }
  func.func @transform_2(%arg0: i32, %arg1: i32) -> (i32, i32, i32, i32) {
    %c0_i32 = arith.constant 0 : i32
    %c0_i32_0 = arith.constant 0 : i32
    %c0_i32_1 = arith.constant 0 : i32
    return %arg0, %arg1, %c0_i32, %c0_i32_0 : i32, i32, i32, i32
  }
}

</mosaic_0001>

<bundles_post_ra>
// kernel: tpu_custom_call.1
= control target key start
LH: loop header
LB: loop body
LE: loop exit
PB: predicated region body
PF: predicated region fallthrough
CT: control target
= control target key end

     0   :  { %7 = vsyncpa [#allocation3], 0  ;;  %s1044_s0 = inlined_call_operand.hbm [shape: bf16[2,72,256], index: 0, kind: input, shape index: {}]   ;;  %s1045_s1 = inlined_call_operand.hbm [shape: bf16[1,16,72], index: 1, kind: input, shape index: {}]   ;;  %s1046_s2 = inlined_call_operand.hbm [shape: f32[2,1,16,256], index: 2, kind: output, shape index: {}]  }
   0x1   :  { %9 = vsyncpa [#allocation3 + $0x1], 0 }
   0x2   :  { %10 = vsyncpa [#allocation6], 0 }
   0x3   :  { %11 = vsyncpa [#allocation4], 0 }
   0x4   :  { %13 = vsyncpa [#allocation4 + $0x1], 0  ;;  %s822_s9 = smov 0   ;;  %s824_s10 = smov 0  }
   0x5   :  { %s826_s11 = smov 0   ;;  %s828_s12 = smov 0  }
   0x6   :  { %s830_s13 = smov 0   ;;  %s832_s14 = smov 0  }
   0x7 LB: > { %s521_s15 = sadd.s32 4294967295, %s795_s14   ;;  %s522_s16 = sadd.s32 4294967294, %s795_s14   ;;  %s795_s14 = sphi %s832_s14, %s19_s14   ;;  %s791_s13 = sphi %s830_s13, %s1069_s13   ;;  %s787_s12 = sphi %s828_s12, %s1068_s12   ;;  %s783_s11 = sphi %s826_s11, %s1067_s11   ;;  %s779_s10 = sphi %s824_s10, %s1066_s10   ;;  %s775_s9 = sphi %s822_s9, %s1065_s9  }
   0x8   : > { %p51_p0 = scmp.ne.s32.totalorder %s779_s10, %s775_s9  ;;  %p856_p1 = scmp.eq.s32.totalorder %s521_s15, 0 }
   0x9   : > { %p860_p2 = scmp.eq.s32.totalorder %s521_s15, 1  ;;  %p109_p3 = scmp.eq.s32.totalorder %s522_s16, 1 }
   0xa   : > { %s1051_s17 = scalar_select %p856_p1, 1, 0 }
   0xb   : > { %s1052_s18 = scalar_select %p860_p2, 1, 0 }
   0xc   : > { %p866_p4 = por %p856_p1, %p51_p0  ;;  %p523_p5 = scmp.ge.s32.totalorder %s795_s14, 1 }
   0xd   : > { %p871_p6 = por %p109_p3, %p51_p0  ;;  %p116_p7 = scmp.lt.s32.totalorder %s795_s14, 3 }
   0xe   : > { %s1053_s19 = scalar_select %p866_p4, 1, 0 }
   0xf   : > { %s1054_s20 = scalar_select %p871_p6, 1, 0 }
  0x10   : > { %p876_p8 = pnand %p523_p5, %p116_p7  ;;  %s797_s22 = smov [#allocation5]  }
  0x11   : > { %s131_s23 = sshll.u32 %s797_s22, 4  ;;  %s31_s25 = sadd.s32 1, %s791_s13  ;;  %s132_s23 = int_to_ptr.vmem [resolvable:$true] %s131_s23 }
  0x12   : > { %s1055_s21 = scalar_select %p876_p8, 1, 0 }
  0x13   : > { %p560_p9 = pneg %p876_p8  ;;  %s651_s28 = scalar_lea.hbm %s1045_s1, 128 }
  0x14   : > { %p652_p12 = scmp.ne.s32.totalorder %s1045_s1, %s651_s28  ;;  %p658_p5 = scmp.lt.u32.totalorder %s651_s28, %s1045_s1 }
  0x15   : > { %p885_p11 = pnand %p560_p9, %p856_p1 }
  0x17   : > { %p653_p13 = pneg %p885_p11 }
  0x19   : > { %p654_p0 = pnand %p653_p13, %p652_p12 }
  0x1b   : > { %p655_p3 = pneg %p654_p0 }
  0x1d   : > { %p660_p7 = pnand %p658_p5, %p655_p3 }
  0x1f   : > { %663 = shalt.err (!%p660_p7)
}
  0x20   : > { %s664_s5 = scalar_lea.vmem %s132_s23, 128  ;;  %p672_p1 = scmp.lt.s32.totalorder %s132_s23, %s132_s23 }
  0x21   : > { %p665_p9 = scmp.ne.s32.totalorder %s132_s23, %s664_s5  ;;  %p673_p4 = scmp.lt.s32.totalorder %s664_s5, %s664_s5 }
  0x23   : > { %p667_p10 = pnand %p665_p9, %p653_p13  ;;  %p674_p8 = por %p673_p4, %p672_p1 }
  0x25   : > { %p668_p6 = pneg %p667_p10 }
  0x27   : > { %p675_p2 = pnand %p674_p8, %p668_p6 }
  0x29   : > { %678 = shalt.err (!%p675_p2)
}
  0x2a   : > { %s798_s6 = smov 64   ;;  %s799_s7 = smov 4  }
  0x2b   : > { %563 = dma.hbm_to_vmem [thread:$0]  (!%p885_p11), %s1045_s1, 128, %s132_s23, [#allocation6], %s798_s6, %s798_s6, %s799_s7  }
  0x2c   : > { %p33_p1 = scmp.ge.s32.totalorder %s31_s25, 2  ;;  %s38_s16 = sadd.s32 1, %s783_s11 }
  0x2d   : > { %p45_p2 = scmp.ne.s32.totalorder %s783_s11, %s779_s10  ;;  %p46_p4 = scmp.eq.s32.totalorder %s795_s14, 0 }
  0x2e   : > { %s1071_s25 = smov (%p33_p1, %s31_s25), 0  ;;  %p1057_p8 = scmp.ne.s32.totalorder %s1052_s18, 0 }
  0x2f   : > { %p47_p6 = por %p46_p4, %p45_p2  ;;  %s35_s26 = ssub.s32 %s791_s13, %s1071_s25 }
  0x30   : > { %p914_p10 = por %p1057_p8, %p45_p2  ;;  %p573_p12 = scmp.lt.s32.totalorder %s795_s14, 2 }
  0x31   : > { %p36_p13 = scmp.eq.s32.totalorder %s35_s26, 0  ;;  %s145_s24 = sand.u32 1, %s783_s11  }
  0x32   : > { %s549_s27 = smul.u32 72, %s145_s24  ;;  %p926_p11 = pnand %p573_p12, %p47_p6 }
  0x33   : > { %s923_s28 = scalar_select %p36_p13, %s783_s11, %s38_s16  }
  0x34   : > { %s550_s23 = smul.u32 1152, %s791_s13  ;;  %s149_s29 = scalar_lea.vmem [#allocation2], %s549_s27 }
  0x35   : > { %s156_s30 = sshll.u32 %s149_s29, 4  ;;  %s937_s6 = scalar_lea.sflag [#allocation3], %s145_s24  ;;  %s935_s30 = int_to_ptr.vmem [resolvable:$true] %s156_s30 }
  0x36   : > { %s933_s5 = scalar_lea.hbm %s1044_s0, %s550_s23  ;;  %p681_p3 = pneg %p926_p11 }
  0x37   : > { %s679_s7 = scalar_lea.hbm %s933_s5, 1152  ;;  %s684_s16 = scalar_lea.hbm %s1044_s0, 2304 }
  0x38   : > { %p680_p0 = scmp.ne.s32.totalorder %s933_s5, %s679_s7  ;;  %p685_p9 = scmp.lt.u32.totalorder %s933_s5, %s1044_s0 }
  0x39   : > { %p686_p1 = scmp.lt.u32.totalorder %s684_s16, %s679_s7  ;;  %p688_p4 = scmp.lt.u32.totalorder %s679_s7, %s933_s5 }
  0x3a   : > { %p682_p5 = pnand %p681_p3, %p680_p0 }
  0x3b   : > { %p687_p2 = por %p686_p1, %p685_p9 }
  0x3c   : > { %p683_p7 = pneg %p682_p5 }
  0x3d   : > { %p689_p6 = por %p688_p4, %p687_p2 }
  0x3f   : > { %p690_p8 = pnand %p689_p6, %p683_p7 }
  0x41   : > { %693 = shalt.err (!%p690_p8)
}
  0x42   : > { %s694_s24 = scalar_lea.vmem %s935_s30, 1152  ;;  %s800_s23 = smov [#allocation2]  }
  0x43   : > { %p695_p12 = scmp.ne.s32.totalorder %s935_s30, %s694_s24  ;;  %s699_s29 = sshll.u32 %s800_s23, 4  ;;  %s700_s29 = int_to_ptr.vmem [resolvable:$false] %s699_s29 }
  0x44   : > { %s701_s4 = scalar_lea.vmem %s700_s29, 2304  ;;  %p702_p5 = scmp.lt.s32.totalorder %s935_s30, %s700_s29 }
  0x45   : > { %p697_p13 = pnand %p695_p12, %p681_p3  ;;  %p703_p9 = scmp.lt.s32.totalorder %s701_s4, %s694_s24 }
  0x47   : > { %p698_p0 = pneg %p697_p13  ;;  %p704_p1 = por %p703_p9, %p702_p5 }
  0x49   : > { %p705_p2 = pnand %p704_p1, %p698_p0 }
  0x4b   : > { %708 = shalt.err (!%p705_p2)
}
  0x4c   : > { %s801_s18 = smov 128   ;;  %s802_s7 = smov 8  }
  0x4d   : > { %567 = dma.hbm_to_vmem [thread:$0]  (!%p926_p11), %s933_s5, 1152, %s935_s30, %s937_s6, %s801_s18, %s801_s18, %s802_s7  }
  0x4e   : > { %p1060_p3 = scmp.ne.s32.totalorder %s1055_s21, 0 }
  0x4f   : > { %s968_s8 = sand.u32 (!%p1060_p3), 1, %s779_s10   ;;  %p1061_p7 = scmp.ne.s32.totalorder (!%p1060_p3), %s1053_s19, 0 }
  0x50   : > { %168 = sbr.rel (%p1060_p3) target bundleno = 653 (0x28d), region = 28  ;;  %s171_s16 = scalar_lea.sflag (!%p1060_p3), [#allocation3], %s968_s8 }
  0x51   : > { %s551_s15 = smul.u32 (!%p1060_p3), 72, %s968_s8 }
  0x53   : > { %s174_s26 = scalar_lea.vmem (!%p1060_p3), [#allocation2], %s551_s15 }
  0x57   : > { %762 = dma.done.wait (%p1061_p7), %s171_s16, 1152  }
  0x58   : > { %764 = vsyncadd (%p1061_p7), %s171_s16, 4294966144  ;;  %p1062_p4 = scmp.ne.s32.totalorder %s1051_s17, 0 }
  0x5a   : > { %766 = dma.done.wait (%p1062_p4), [#allocation6], 128  }
  0x5b   : > { %768 = vsyncadd (%p1062_p4), [#allocation6], 4294967168  ;;  %v803_v0 = vmov 0   ;;  %v634_v1 = vld [vmem:[%s174_s26 + $0x4] ss:$8 sps:$4 sm:$0xff]   ;;  %vm265_vm0 = vcmask 1043456  }
  0x5c   : > { %304 = vmatprep.mubr.bf16.mxu0 %v803_v0  ;;  %632 = vset.pattern.permute.xlu1 %v803_v0  ;;  %v636_v2 = vld [vmem:[%s174_s26] ss:$8 sps:$4 sm:$0xff]   ;;  %v637_v3 = vld [vmem:[%s174_s26 + $0x14] ss:$8 sps:$4 sm:$0xff]   ;;  %v639_v4 = vld [vmem:[%s174_s26 + $0x10] ss:$8 sps:$4 sm:$0xff]  }
  0x5d   : > { %633 = vset.pattern.permute.xlu0 %v803_v0  ;;  %272 = vmatprep.subr.bf16.mxu0 %v634_v1  ;;  %v640_v5 = vld [vmem:[%s174_s26 + $0x24] ss:$8 sps:$4 sm:$0xff]   ;;  %v642_v6 = vld [vmem:[%s174_s26 + $0x20] ss:$8 sps:$4 sm:$0xff]   ;;  %v643_v7 = vld [vmem:[%s174_s26 + $0x34] ss:$8 sps:$4 sm:$0xff]  }
  0x5e   : > { %273 = vmatpush1.bf16.msra.mxu0 %v636_v2  ;;  %v210_v8 = vld [vmem:[%s174_s26 + $0x40] sm:$0xff]  ;;  %v645_v9 = vld [vmem:[%s174_s26 + $0x30] ss:$8 sps:$4 sm:$0xff]   ;;  %vm261_vm1 = vcmask 588800   ;;  %s529_s17 = sshll.u32 %s968_s8, 5  ;;  %s548_s30 = sshll.u32 %s787_s12, 9 }
  0x5f   : > { %274 = vmatprep.subr.bf16.mxu0 %v637_v3  ;;  %v540_v10 = vcombine.high %v210_v8, %v210_v8  ;;  %v539_v11 = vcombine.low %v210_v8, %v210_v8  ;;  %v648_v13 = vld [vmem:[#allocation5] sm:$0xff]   ;;  %s198_s19 = scalar_lea.vmem [#allocation7], %s529_s17  ;;  %s995_s6 = scalar_lea.hbm %s1046_s2, %s548_s30 }
  0x60   : > { %s425_s21 = sshll.u32 %s198_s19, 4  ;;  %s410_s12 = scalar_lea.sflag [#allocation4], %s968_s8  ;;  %s990_s21 = int_to_ptr.vmem [resolvable:$true] %s425_s21 }
  0x61   : > { %v267_v12 = vsel %vm265_vm0, %v539_v11, 0  ;;  %s709_s27 = scalar_lea.vmem %s990_s21, 512  ;;  %s804_s24 = smov [#allocation7]  }
  0x62   : > { %275 = vmatpush1.bf16.msra.mxu0 %v639_v4  ;;  %p710_p11 = scmp.ne.s32.totalorder %s990_s21, %s709_s27  ;;  %s713_s23 = sshll.u32 %s804_s24, 4  ;;  %s714_s23 = int_to_ptr.vmem [resolvable:$false] %s713_s23 }
  0x63   : > { %276 = vmatprep.subr.bf16.mxu0 %v640_v5  ;;  %s715_s29 = scalar_lea.vmem %s714_s23, 1024  ;;  %p716_p12 = scmp.lt.s32.totalorder %s990_s21, %s714_s23 }
  0x64   : > { %p711_p6 = pnand %p710_p11, %p914_p10  ;;  %p717_p13 = scmp.lt.s32.totalorder %s715_s29, %s709_s27 }
  0x66   : > { %277 = vmatpush1.bf16.msra.mxu0 %v642_v6  ;;  %p712_p8 = pneg %p711_p6  ;;  %p718_p0 = por %p717_p13, %p716_p12 }
  0x67   : > { %278 = vmatprep.subr.bf16.mxu0 %v643_v7 }
  0x68   : > { %p719_p5 = pnand %p718_p0, %p712_p8 }
  0x6a   : > { %279 = vmatpush1.bf16.msra.mxu0 %v645_v9 }
  0x6b   : > { %541 = vmatprep.subr.msk.bf16.mxu0 %vm265_vm0, %v540_v10 }
  0x6e   : > { %281 = vmatpush1.bf16.msra.mxu0 %v267_v12 }
  0x71   : > { %542 = vmatmul.mubr.msk.bf16.vlgmr.msra.gmra.mrb[0].mxu0 %vm261_vm1, %v648_v13 }
 0x144   : > { %v306_v14 = vpop.f32.mrb[0].mxu0 }
 0x145   : > { %v315_v15 = vmul.f32 %v306_v14, %v306_v14  ;;  %v321_v16 = vrot.slane %v306_v14, 4  ;;  %v308_v17 = vpop.f32.mrb[1].mxu0 }
 0x146   : > { %v316_v18 = vmul.f32 %v308_v17, %v308_v17  ;;  %v322_v19 = vrot.slane %v308_v17, 4  ;;  %v310_v20 = vpop.f32.mrb[2].mxu0 }
 0x147   : > { %v325_v21 = vadd.f32 %v321_v16, %v306_v14  ;;  %v339_v22 = vrot.slane %v315_v15, 4  ;;  %v317_v23 = vmul.f32 %v310_v20, %v310_v20  ;;  %v312_v24 = vpop.f32.mrb[3].mxu0  ;;  %v331_v30 = vrot.slane %v310_v20, 4 }
 0x148   : > { %v340_v25 = vrot.slane %v316_v18, 4  ;;  %v318_v26 = vmul.f32 %v312_v24, %v312_v24  ;;  %v326_v27 = vadd.f32 %v322_v19, %v308_v17  ;;  %v332_v32 = vrot.slane %v312_v24, 4 }
 0x149   : > { %v343_v28 = vadd.f32 %v339_v22, %v315_v15  ;;  %v327_v29 = vadd.f32 %v325_v21, %v310_v20  ;;  %v349_v36 = vrot.slane %v317_v23, 4 }
 0x14a   : > { %v328_v31 = vadd.f32 %v326_v27, %v312_v24  ;;  %v344_v33 = vadd.f32 %v340_v25, %v316_v18  ;;  %v350_v38 = vrot.slane %v318_v26, 4 }
 0x14b   : > { %v335_v34 = vadd.f32 %v331_v30, %v327_v29  ;;  %v345_v35 = vadd.f32 %v343_v28, %v317_v23 }
 0x14c   : > { %v346_v37 = vadd.f32 %v344_v33, %v318_v26  ;;  %v336_v39 = vadd.f32 %v332_v32, %v328_v31 }
 0x14d   : > { %v355_v40 = vsel %vm265_vm0, %v335_v34, 0.0  ;;  %v353_v41 = vadd.f32 %v349_v36, %v345_v35 }
 0x14e   : > { %v356_v42 = vsel %vm265_vm0, %v336_v39, 0.0  ;;  %v354_v43 = vadd.f32 %v350_v38, %v346_v37 }
 0x14f   : > { %v357_v44 = vadd.f32 %v356_v42, %v355_v40  ;;  %v361_v45 = vsel %vm265_vm0, %v353_v41, 0.0 }
 0x150   : > { %v362_v46 = vsel %vm265_vm0, %v354_v43, 0.0 }
 0x151   : > { %358 = vadd.xlane.f32.xlu0 %v357_v44  ;;  %v363_v47 = vadd.f32 %v362_v46, %v361_v45 }
 0x155   : > { %364 = vadd.xlane.f32.xlu0 %v363_v47 }
 0x1de   : > { %v359_v48 = vpop.xlane.xlu0 %358 }
 0x1df   : > { %v360_v49 = vmul.f32 0.0009765625, %v359_v48 }
 0x1e1   : > { %v372_v50 = vrot.slane %v360_v49, 4  ;;  %v367_v52 = vmul.f32 %v360_v49, %v360_v49 }
 0x1e2   : > { %v365_v51 = vpop.xlane.xlu0 %364 }
 0x1e3   : > { %v366_v53 = vmul.f32 0.0009765625, %v365_v51  ;;  %v374_v54 = vsel %vm265_vm0, %v360_v49, %v372_v50 }
 0x1e4   : > { %381 = vperm.xlu1 %632, %v374_v54  }
 0x1e5   : > { %v368_v55 = vsub.f32 %v366_v53, %v367_v52 }
 0x1e7   : > { %v369_v56 = vadd.f32 1e-05, %v368_v55 }
 0x1e9   : > { %649 = vrsqrt.f32 %v369_v56 }
 0x1f3   : > { %v650_v57 = vpop.eup %649 }
 0x1f4   : > { %v376_v58 = vrot.slane %v650_v57, 4 }
 0x1f6   : > { %v378_v59 = vsel %vm265_vm0, %v650_v57, %v376_v58 }
 0x1f7   : > { %390 = vperm.xlu1 %632, %v378_v59  }
 0x263   : > { %v382_v60 = vpop.permute.xlu1 %381 }
 0x264   : > { %v384_v61 = vsub.f32 %v306_v14, %v382_v60  ;;  %v385_v62 = vsub.f32 %v308_v17, %v382_v60  ;;  %v386_v63 = vsub.f32 %v310_v20, %v382_v60  ;;  %v387_v0 = vsub.f32 %v312_v24, %v382_v60 }
 0x276   : > { %v391_v1 = vpop.permute.xlu1 %390 }
 0x277   : > { %v393_v2 = vmul.f32 %v391_v1, %v384_v61  ;;  %v394_v3 = vmul.f32 %v391_v1, %v385_v62  ;;  %v395_v4 = vmul.f32 %v391_v1, %v386_v63  ;;  %v396_v5 = vmul.f32 %v391_v1, %v387_v0 }
 0x279   : > { %v397_v6 = vmul.f32 0.2, %v393_v2  ;;  %v398_v7 = vmul.f32 0.2, %v394_v3  ;;  %v399_v8 = vmul.f32 0.2, %v395_v4 }
 0x27a   : > { %v400_v9 = vmul.f32 0.2, %v396_v5 }
 0x27b   : > { %v401_v10 = vmax.f32 %v393_v2, %v397_v6  ;;  %v402_v11 = vmax.f32 %v394_v3, %v398_v7  ;;  %v403_v12 = vmax.f32 %v395_v4, %v399_v8 }
 0x27c   : > { %v404_v13 = vmax.f32 %v396_v5, %v400_v9 }
 0x27d   : > { %405 = vst [vmem:[%s198_s19] sm:$0xff] %v401_v10  ;;  %406 = vst [vmem:[%s198_s19 + $0x8] sm:$0xff] %v402_v11 }
 0x27e   : > { %407 = vst [vmem:[%s198_s19 + $0x10] sm:$0xff] %v403_v12  ;;  %408 = vst [vmem:[%s198_s19 + $0x18] sm:$0xff] %v404_v13 }
 0x27f   : > { %722 = shalt.err (!%p719_p5)
}
 0x280   : > { %s723_s4 = scalar_lea.hbm %s995_s6, 512  ;;  %s727_s15 = scalar_lea.hbm %s1046_s2, 1024 }
 0x281   : > { %p724_p9 = scmp.ne.s32.totalorder %s995_s6, %s723_s4  ;;  %p728_p3 = scmp.lt.u32.totalorder %s995_s6, %s1046_s2 }
 0x282   : > { %p729_p7 = scmp.lt.u32.totalorder %s727_s15, %s723_s4  ;;  %p731_p11 = scmp.lt.u32.totalorder %s723_s4, %s995_s6 }
 0x283   : > { %p725_p1 = pnand %p724_p9, %p914_p10 }
 0x284   : > { %p730_p4 = por %p729_p7, %p728_p3 }
 0x285   : > { %p726_p2 = pneg %p725_p1 }
 0x286   : > { %p732_p6 = por %p731_p11, %p730_p4 }
 0x288   : > { %p733_p8 = pnand %p732_p6, %p726_p2 }
 0x28a   : > { %736 = shalt.err (!%p733_p8)
}
 0x28b   : > { %s805_s17 = smov 256   ;;  %s806_s19 = smov 16  }
 0x28c   : > { %558 = dma.vmem_to_hbm [thread:$0]  (%p914_p10), %s990_s21, 512, %s995_s6, %s410_s12, %s805_s17, %s805_s17, %s806_s19  }
 0x28d PF: > { %s440_s30 = sand.u32 1, %s775_s9   ;;  %p1063_p12 = scmp.ne.s32.totalorder %s1054_s20, 0 }
 0x28e   : > { %p1064_p13 = scmp.ge.s32.totalorder %s795_s14, 2  ;;  %s441_s3 = scalar_lea.sflag [#allocation4], %s440_s30 }
 0x290   : > { %p569_p0 = pnand %p1064_p13, %p1063_p12 }
 0x292   : > { %770 = dma.done.wait (!%p569_p0), %s441_s3, 512  }
 0x293   : > { %772 = vsyncadd (!%p569_p0), %s441_s3, 4294966784  ;;  %s19_s14 = sadd.s32 1, %s795_s14   ;;  %s1065_s9 = smov %s779_s10 }
 0x294   : > { %p16_p5 = scmp.ge.s32.totalorder %s19_s14, 4   ;;  %s1066_s10 = smov %s783_s11 }
 0x295   : > { %s1067_s11 = smov %s923_s28  ;;  %s1068_s12 = smov %s791_s13 }
 0x296   : > { %s1069_s13 = smov %s1071_s25  ;;  %18 = sbr.rel (!%p16_p5) target bundleno = 7 (0x7), region = 78 }
 0x29d   :  { %446 = vsyncpa [#allocation3], 1 }
 0x29e   :  { %448 = vsyncpa [#allocation3 + $0x1], 1 }
 0x29f   :  { %449 = vsyncpa [#allocation6], 1 }
 0x2a0   :  { %450 = vsyncpa [#allocation4], 1 }
 0x2a1   :  { %452 = vsyncpa [#allocation4 + $0x1], 1 }

</bundles_post_ra>
